<compile_context>
chip_gen: v5e
topology: v5e:2x2
jax: 0.10.0
libtpu: 0.0.40
codegen_flags: <defaults>
</compile_context>

<pallas_src>
import functools

import jax
import jax.numpy as jnp
from jax.experimental import pallas as pl
from jax.experimental.pallas import tpu as pltpu

_LANE = 128
_MAX_UNROLL_CHUNKS = 32  # cap for fully-unrolled chunk loops (LLO visibility)


def channel_gate_kernel(x_ref, w1_ref, b1_ref, w2_ref, b2_ref, o_ref, *,
                        hw_valid, c_sub):
    """One batch tile of the ChannelGate forward.

    x_ref : (Bt, C, HW_pad) f32   (HW_pad multiple of 128; >= hw_valid)
    w1_ref: (C, Ch)  f32  (first Linear weight, transposed vs torch)
    b1_ref: (1, Ch)  f32
    w2_ref: (Ch, C)  f32  (second Linear weight, transposed vs torch)
    b2_ref: (1, C)   f32
    o_ref : (Bt, C, HW_pad) f32
    """
    bt, c, hw_pad = x_ref.shape
    n_chunks = hw_pad // _LANE
    n_csub = c // c_sub
    tail_valid = hw_valid - (n_chunks - 1) * _LANE   # valid lanes in last chunk
    need_mask = tail_valid < _LANE
    if need_mask:
        lane_idx = jax.lax.broadcasted_iota(jnp.int32, (1, 1, _LANE), 2)

    def mask_tail(chunk, fill):
        if not need_mask:
            return chunk
        return jnp.where(lane_idx < tail_valid, chunk, fill)

    # --- streaming avg / max pools over the spatial (lane) axis --------------
    # Chunks are read off the ref one at a time; only run_sum, run_max and the
    # current chunk are live (<= ~48 vregs thanks to the channel sub-tiling).
    sum_parts = []
    max_parts = []
    for ci in range(n_csub):
        c0 = ci * c_sub

        def chunk_at(j, c0=c0):
            start = pl.multiple_of(j * _LANE, _LANE)
            return x_ref[:, pl.ds(c0, c_sub), pl.ds(start, _LANE)]

        first = chunk_at(0)
        if n_chunks == 1:
            run_sum = mask_tail(first, 0.0).astype(jnp.float32)
            run_max = mask_tail(first, -jnp.inf)
        else:
            run_sum = first.astype(jnp.float32)
            run_max = first
            if n_chunks > 2:
                if n_chunks <= _MAX_UNROLL_CHUNKS:
                    for j in range(1, n_chunks - 1):
                        ch = chunk_at(j)
                        run_sum = run_sum + ch
                        run_max = jnp.maximum(run_max, ch)
                else:
                    def body(j, carry):
                        rs, rm = carry
                        ch = chunk_at(j)
                        return rs + ch, jnp.maximum(rm, ch)
                    run_sum, run_max = jax.lax.fori_loop(
                        1, n_chunks - 1, body, (run_sum, run_max))
            last = chunk_at(n_chunks - 1)
            run_sum = run_sum + mask_tail(last, 0.0)
            run_max = jnp.maximum(run_max, mask_tail(last, -jnp.inf))

        sum_parts.append(jnp.sum(run_sum, axis=-1))    # (Bt, c_sub)  XLU reduce
        max_parts.append(jnp.max(run_max, axis=-1))    # (Bt, c_sub)

    sum_pool = sum_parts[0] if n_csub == 1 else jnp.concatenate(sum_parts, -1)
    max_pool = max_parts[0] if n_csub == 1 else jnp.concatenate(max_parts, -1)
    avg_pool = sum_pool * (1.0 / float(hw_valid))                  # (Bt, C)

    # --- fused shared MLP on stacked [avg; max] pools (one dot->ReLU->dot) ---
    pooled = jnp.concatenate(
        [avg_pool, max_pool.astype(jnp.float32)], axis=0)          # (2*Bt, C)
    h = jnp.dot(pooled, w1_ref[...], preferred_element_type=jnp.float32)
    h = jnp.maximum(h + b1_ref[...], 0.0)                          # ReLU
    att = jnp.dot(h, w2_ref[...], preferred_element_type=jnp.float32)
    att = att + b2_ref[...]                                        # (2*Bt, C)
    scale = jax.nn.sigmoid(att[:bt, :] + att[bt:, :])              # (Bt, C)

    # --- streaming broadcast-multiply + lane-dense stores ---------------------
    for ci in range(n_csub):
        c0 = ci * c_sub
        # Broadcast / relayout of scale hoisted out of the chunk loop.
        scale_b = jnp.broadcast_to(scale[:, c0:c0 + c_sub, None],
                                   (bt, c_sub, _LANE))

        def store_chunk(j, c0=c0, scale_b=scale_b):
            start = pl.multiple_of(j * _LANE, _LANE)
            o_ref[:, pl.ds(c0, c_sub), pl.ds(start, _LANE)] = (
                x_ref[:, pl.ds(c0, c_sub), pl.ds(start, _LANE)] * scale_b
            ).astype(o_ref.dtype)

        if n_chunks <= _MAX_UNROLL_CHUNKS:
            for j in range(n_chunks):
                store_chunk(j)
        else:
            def body(j, carry):
                store_chunk(j)
                return carry
            jax.lax.fori_loop(0, n_chunks, body, 0)


def _tpu_memory_and_cores():
    """VMEM capacity + a 'how many TensorCores share this chip' guess."""
    vmem_cap = 64 * 1024 * 1024            # conservative default (v7x)
    try:
        info = pltpu.get_tpu_info()
        vmem_cap = int(getattr(info, "vmem_capacity_bytes", vmem_cap))
    except Exception:
        pass
    kind = ""
    try:
        kind = jax.devices()[0].device_kind.lower()
    except Exception:
        pass
    cores = 2 if ("v7" in kind or vmem_cap <= 64 * 1024 * 1024) else 1
    return vmem_cap, cores


def _choose_tiling(B, C, HW_pad, Ch, itemsize):
    """Pick (Bt, buffer_count, vmem_limit) from the chip's real VMEM budget."""
    vmem_cap, cores = _tpu_memory_and_cores()
    per_batch = C * HW_pad * itemsize
    weight_bytes = (C * Ch + Ch + Ch * C + C) * 4
    slack = 2 * 1024 * 1024

    # budget available for the double-buffered x-in + out blocks (4 * block)
    pipelined_budget = int(0.75 * vmem_cap) - 2 * weight_bytes - slack
    big_chip = vmem_cap > (64 << 20)
    target_block = min(max(pipelined_budget // 4, per_batch),
                       (16 << 20) if big_chip else (12 << 20))

    bt = max(1, min(B, target_block // per_batch))
    # On megacore (v7x) aim for >= 2 grid steps per TensorCore when B allows,
    # so BlockSpec double-buffering has something to overlap on each core.
    if cores >= 2 and B >= 2:
        bt = min(bt, max(1, B // min(B, 2 * cores)))
    while B % bt:
        bt -= 1

    block_bytes = bt * per_batch
    buffers = 2
    if 4 * block_bytes + 2 * weight_bytes + slack > int(0.9 * vmem_cap):
        # A single batch item can't be double-buffered on this chip: drop to
        # single-buffering the big operands instead of overrunning VMEM.
        buffers = 1
    need = 2 * buffers * block_bytes + 2 * weight_bytes + slack
    vmem_limit = int(min(int(0.9 * vmem_cap), max(need, 32 << 20)))
    return bt, buffers, vmem_limit


def _pick_c_sub(C, Bt, row_budget=128):
    """Largest divisor of C with Bt*c_sub <= row_budget rows, so the three
    live (rows, 128) accumulators stay <= ~48 vregs (no spills)."""
    target = max(1, row_budget // max(Bt, 1))
    cs = max(1, min(C, target))
    while C % cs:
        cs -= 1
    return cs


def channel_gate(x_nchw, w1, b1, w2, b2):
    """x_nchw: (B, C, H, W) float32.  Returns (B, C, H, W) float32."""
    B, C, H, W = x_nchw.shape
    HW = H * W
    HW_pad = ((HW + _LANE - 1) // _LANE) * _LANE
    Ch = w1.shape[1]

    x = x_nchw.reshape(B, C, HW)
    if HW_pad != HW:
        # Keep the big output stream lane-dense (unmasked vst); padded lanes
        # are statically masked out of the pools inside the kernel.
        x = jnp.pad(x, ((0, 0), (0, 0), (0, HW_pad - HW)))
    b1_2d = b1.reshape(1, Ch)
    b2_2d = b2.reshape(1, C)

    Bt, buffers, vmem_limit = _choose_tiling(B, C, HW_pad, Ch, x.dtype.itemsize)
    c_sub = _pick_c_sub(C, Bt)
    grid = (B // Bt,)

    big_kwargs = {} if buffers == 2 else {"pipeline_mode": pl.Buffered(1)}
    x_spec = pl.BlockSpec((Bt, C, HW_pad), lambda b: (b, 0, 0), **big_kwargs)
    o_spec = pl.BlockSpec((Bt, C, HW_pad), lambda b: (b, 0, 0), **big_kwargs)

    kernel = functools.partial(channel_gate_kernel, hw_valid=HW, c_sub=c_sub)

    out = pl.pallas_call(
        kernel,
        out_shape=jax.ShapeDtypeStruct((B, C, HW_pad), x.dtype),
        grid_spec=pltpu.PrefetchScalarGridSpec(
            num_scalar_prefetch=0,
            grid=grid,
            in_specs=[
                x_spec,
                pl.BlockSpec((C, Ch), lambda b: (0, 0)),
                pl.BlockSpec((1, Ch), lambda b: (0, 0)),
                pl.BlockSpec((Ch, C), lambda b: (0, 0)),
                pl.BlockSpec((1, C), lambda b: (0, 0)),
            ],
            out_specs=o_spec,
        ),
        compiler_params=pltpu.CompilerParams(
            dimension_semantics=("parallel",),
            vmem_limit_bytes=vmem_limit,
        ),
    )(x, w1, b1_2d, w2, b2_2d)

    if HW_pad != HW:
        out = out[:, :, :HW]
    return out.reshape(B, C, H, W)


def channel_gate_ref(x_nchw, w1, b1, w2, b2):
    """Pure-JAX reference matching the PyTorch forward (pool_types=['avg','max'])."""
    B, C, H, W = x_nchw.shape
    xf = x_nchw.reshape(B, C, H * W)
    avg_pool = jnp.mean(xf, axis=-1)
    max_pool = jnp.max(xf, axis=-1)

    def mlp(p):
        h = jnp.maximum(p @ w1 + b1, 0.0)
        return h @ w2 + b2

    att = mlp(avg_pool) + mlp(max_pool)
    scale = jax.nn.sigmoid(att)
    return x_nchw * scale[:, :, None, None]


if __name__ == "__main__":
    # Module config: gate_channels=64, reduction_ratio=16 -> hidden = 4
    B, C, H, W = 2, 64, 16, 16
    reduction_ratio = 16
    Ch = C // reduction_ratio

    key = jax.random.PRNGKey(0)
    k_x, k_w1, k_b1, k_w2, k_b2 = jax.random.split(key, 5)

    x = jax.random.normal(k_x, (B, C, H, W), dtype=jnp.float32)

    # nn.Linear weights are (out, in) in torch; stored here pre-transposed as
    # (in, out) for row-vector @ weight.
    w1 = jax.random.normal(k_w1, (C, Ch), dtype=jnp.float32) * (1.0 / jnp.sqrt(C))
    b1 = jax.random.normal(k_b1, (Ch,), dtype=jnp.float32) * 0.01
    w2 = jax.random.normal(k_w2, (Ch, C), dtype=jnp.float32) * (1.0 / jnp.sqrt(Ch))
    b2 = jax.random.normal(k_b2, (C,), dtype=jnp.float32) * 0.01

    out = channel_gate(x, w1, b1, w2, b2)
    out = jax.block_until_ready(out)

    ref = channel_gate_ref(x, w1, b1, w2, b2)
    assert out.shape == (B, C, H, W)
    assert jnp.allclose(out, ref, atol=1e-5, rtol=1e-5), "mismatch vs reference"

    print("KERNEL_OK")
</pallas_src>

<mosaic_0001>
module attributes {stable_mosaic.version = 11 : i64} {
  func.func @channel_gate_kernel(%arg0: i32, %arg1: memref<1x64x256xf32, #tpu.memory_space<vmem>>, %arg2: memref<64x4xf32, #tpu.memory_space<vmem>>, %arg3: memref<1x4xf32, #tpu.memory_space<vmem>>, %arg4: memref<4x64xf32, #tpu.memory_space<vmem>>, %arg5: memref<1x64xf32, #tpu.memory_space<vmem>>, %arg6: memref<1x64x256xf32, #tpu.memory_space<vmem>>) attributes {dimension_semantics = [#tpu.dimension_semantics<parallel>], iteration_bounds = array<i64: 2>, scalar_prefetch = 0 : i64, scratch_operands = 0 : i64, tpu.core_type = #tpu.core_type<tc>, window_params = [{transform_indices = @transform_0, window_bounds = array<i64: 1, 64, 256>}, {pipeline_mode = #tpu.pipeline_mode<synchronous>, transform_indices = @transform_1, window_bounds = array<i64: 64, 4>}, {pipeline_mode = #tpu.pipeline_mode<synchronous>, transform_indices = @transform_2, window_bounds = array<i64: 1, 4>}, {pipeline_mode = #tpu.pipeline_mode<synchronous>, transform_indices = @transform_3, window_bounds = array<i64: 4, 64>}, {pipeline_mode = #tpu.pipeline_mode<synchronous>, transform_indices = @transform_4, window_bounds = array<i64: 1, 64>}, {transform_indices = @transform_5, window_bounds = array<i64: 1, 64, 256>}]} {
    %c0_i32 = arith.constant 0 : i32
    %0 = tpu.assume_multiple %c0_i32, 128 : i32
    %c0 = arith.constant 0 : index
    %c0_0 = arith.constant 0 : index
    %1 = arith.index_cast %0 : i32 to index
    %2 = vector.load %arg1[%c0, %c0_0, %1] : memref<1x64x256xf32, #tpu.memory_space<vmem>>, vector<1x64x128xf32>
    %c128_i32 = arith.constant 128 : i32
    %3 = tpu.assume_multiple %c128_i32, 128 : i32
    %c0_1 = arith.constant 0 : index
    %c0_2 = arith.constant 0 : index
    %4 = arith.index_cast %3 : i32 to index
    %5 = vector.load %arg1[%c0_1, %c0_2, %4] : memref<1x64x256xf32, #tpu.memory_space<vmem>>, vector<1x64x128xf32>
    %6 = arith.addf %2, %5 : vector<1x64x128xf32>
    %7 = arith.maximumf %2, %5 : vector<1x64x128xf32>
    %cst = arith.constant dense<0.000000e+00> : vector<1x64xf32>
    %8 = vector.multi_reduction <add>, %6, %cst [2] : vector<1x64x128xf32> to vector<1x64xf32>
    %cst_3 = arith.constant dense<0xFF800000> : vector<1x64xf32>
    %9 = vector.multi_reduction <maximumf>, %7, %cst_3 [2] : vector<1x64x128xf32> to vector<1x64xf32>
    %cst_4 = arith.constant 3.906250e-03 : f32
    %10 = vector.broadcast %cst_4 : f32 to vector<1x64xf32>
    %11 = arith.mulf %8, %10 : vector<1x64xf32>
    %12 = tpu.concatenate %11, %9 in 0 : vector<1x64xf32>, vector<1x64xf32> -> vector<2x64xf32>
    %c0_5 = arith.constant 0 : index
    %c0_6 = arith.constant 0 : index
    %13 = vector.load %arg2[%c0_5, %c0_6] : memref<64x4xf32, #tpu.memory_space<vmem>>, vector<64x4xf32>
    %cst_7 = arith.constant dense<0.000000e+00> : vector<2x4xf32>
    %14 = tpu.matmul %12, %13, %cst_7 {dimension_numbers = #tpu.dot_dimension_numbers<[1], [0], [0], [1], [0, 0, 1, 1], [], []>} : vector<2x64xf32>, vector<64x4xf32>, vector<2x4xf32> -> vector<2x4xf32>
    %c0_8 = arith.constant 0 : index
    %c0_9 = arith.constant 0 : index
    %15 = vector.load %arg3[%c0_8, %c0_9] : memref<1x4xf32, #tpu.memory_space<vmem>>, vector<1x4xf32>
    %16 = vector.broadcast %15 : vector<1x4xf32> to vector<2x4xf32>
    %17 = arith.addf %14, %16 : vector<2x4xf32>
    %cst_10 = arith.constant 0.000000e+00 : f32
    %18 = vector.broadcast %cst_10 : f32 to vector<2x4xf32>
    %19 = arith.maximumf %17, %18 : vector<2x4xf32>
    %c0_11 = arith.constant 0 : index
    %c0_12 = arith.constant 0 : index
    %20 = vector.load %arg4[%c0_11, %c0_12] : memref<4x64xf32, #tpu.memory_space<vmem>>, vector<4x64xf32>
    %cst_13 = arith.constant dense<0.000000e+00> : vector<2x64xf32>
    %21 = tpu.matmul %19, %20, %cst_13 {dimension_numbers = #tpu.dot_dimension_numbers<[1], [0], [0], [1], [0, 0, 1, 1], [], []>} : vector<2x4xf32>, vector<4x64xf32>, vector<2x64xf32> -> vector<2x64xf32>
    %c0_14 = arith.constant 0 : index
    %c0_15 = arith.constant 0 : index
    %22 = vector.load %arg5[%c0_14, %c0_15] : memref<1x64xf32, #tpu.memory_space<vmem>>, vector<1x64xf32>
    %23 = vector.broadcast %22 : vector<1x64xf32> to vector<2x64xf32>
    %24 = arith.addf %21, %23 : vector<2x64xf32>
    %25 = vector.extract_strided_slice %24 {offsets = [0, 0], sizes = [1, 64], strides = [1, 1]} : vector<2x64xf32> to vector<1x64xf32>
    %26 = vector.extract_strided_slice %24 {offsets = [1, 0], sizes = [1, 64], strides = [1, 1]} : vector<2x64xf32> to vector<1x64xf32>
    %27 = arith.addf %25, %26 : vector<1x64xf32>
    %28 = arith.negf %27 : vector<1x64xf32>
    %29 = math.exp %28 : vector<1x64xf32>
    %cst_16 = arith.constant 1.000000e+00 : f32
    %30 = vector.broadcast %cst_16 : f32 to vector<1x64xf32>
    %31 = arith.addf %30, %29 : vector<1x64xf32>
    %32 = arith.divf %30, %31 : vector<1x64xf32>
    %33 = vector.shape_cast %32 : vector<1x64xf32> to vector<1x64x1xf32>
    %34 = vector.shape_cast %33 : vector<1x64x1xf32> to vector<1x64x1xf32>
    %35 = vector.broadcast %34 : vector<1x64x1xf32> to vector<1x64x128xf32>
    %c0_i32_17 = arith.constant 0 : i32
    %36 = tpu.assume_multiple %c0_i32_17, 128 : i32
    %c0_18 = arith.constant 0 : index
    %c0_19 = arith.constant 0 : index
    %37 = arith.index_cast %36 : i32 to index
    %38 = vector.load %arg1[%c0_18, %c0_19, %37] : memref<1x64x256xf32, #tpu.memory_space<vmem>>, vector<1x64x128xf32>
    %39 = arith.mulf %38, %35 : vector<1x64x128xf32>
    %c0_20 = arith.constant 0 : index
    %c0_21 = arith.constant 0 : index
    %40 = arith.index_cast %36 : i32 to index
    %41 = vector.load %arg6[%c0_20, %c0_21, %40] : memref<1x64x256xf32, #tpu.memory_space<vmem>>, vector<1x64x128xf32>
    tpu.vector_store %arg6[%c0_20, %c0_21, %40], %39 {strides = array<i32>} : memref<1x64x256xf32, #tpu.memory_space<vmem>>, vector<1x64x128xf32>,
    %c128_i32_22 = arith.constant 128 : i32
    %42 = tpu.assume_multiple %c128_i32_22, 128 : i32
    %c0_23 = arith.constant 0 : index
    %c0_24 = arith.constant 0 : index
    %43 = arith.index_cast %42 : i32 to index
    %44 = vector.load %arg1[%c0_23, %c0_24, %43] : memref<1x64x256xf32, #tpu.memory_space<vmem>>, vector<1x64x128xf32>
    %45 = arith.mulf %44, %35 : vector<1x64x128xf32>
    %c0_25 = arith.constant 0 : index
    %c0_26 = arith.constant 0 : index
    %46 = arith.index_cast %42 : i32 to index
    %47 = vector.load %arg6[%c0_25, %c0_26, %46] : memref<1x64x256xf32, #tpu.memory_space<vmem>>, vector<1x64x128xf32>
    tpu.vector_store %arg6[%c0_25, %c0_26, %46], %45 {strides = array<i32>} : memref<1x64x256xf32, #tpu.memory_space<vmem>>, vector<1x64x128xf32>,
    return
  }
  func.func @transform_0(%arg0: i32) -> (i32, i32, i32) {
    %c0_i32 = arith.constant 0 : i32
    %c0_i32_0 = arith.constant 0 : i32
    %c0_i32_1 = arith.constant 0 : i32
    return %arg0, %c0_i32, %c0_i32_0 : i32, i32, i32
  }
  func.func @transform_1(%arg0: i32) -> (i32, i32) {
    %c0_i32 = arith.constant 0 : i32
    %c0_i32_0 = arith.constant 0 : i32
    %c0_i32_1 = arith.constant 0 : i32
    return %c0_i32, %c0_i32_0 : i32, i32
  }
  func.func @transform_2(%arg0: i32) -> (i32, i32) {
    %c0_i32 = arith.constant 0 : i32
    %c0_i32_0 = arith.constant 0 : i32
    %c0_i32_1 = arith.constant 0 : i32
    return %c0_i32, %c0_i32_0 : i32, i32
  }
  func.func @transform_3(%arg0: i32) -> (i32, i32) {
    %c0_i32 = arith.constant 0 : i32
    %c0_i32_0 = arith.constant 0 : i32
    %c0_i32_1 = arith.constant 0 : i32
    return %c0_i32, %c0_i32_0 : i32, i32
  }
  func.func @transform_4(%arg0: i32) -> (i32, i32) {
    %c0_i32 = arith.constant 0 : i32
    %c0_i32_0 = arith.constant 0 : i32
    %c0_i32_1 = arith.constant 0 : i32
    return %c0_i32, %c0_i32_0 : i32, i32
  }
  func.func @transform_5(%arg0: i32) -> (i32, i32, i32) {
    %c0_i32 = arith.constant 0 : i32
    %c0_i32_0 = arith.constant 0 : i32
    %c0_i32_1 = arith.constant 0 : i32
    return %arg0, %c0_i32, %c0_i32_0 : i32, i32, i32
  }
}

</mosaic_0001>

<bundles_post_ra>
// kernel: tpu_custom_call.1
= control target key start
LH: loop header
LB: loop body
LE: loop exit
PB: predicated region body
PF: predicated region fallthrough
CT: control target
= control target key end

     0   :  { %10 = vsyncpa [#allocation3], 0  ;;  %s1188_s0 = inlined_call_operand.hbm [shape: f32[2,64,256], index: 0, kind: input, shape index: {}]   ;;  %s1189_s1 = inlined_call_operand.vmem [shape: f32[64,4], index: 1, kind: input, shape index: {}]   ;;  %s1190_s2 = inlined_call_operand.vmem [shape: f32[1,4], index: 2, kind: input, shape index: {}]   ;;  %s1191_s3 = inlined_call_operand.vmem [shape: f32[4,64], index: 3, kind: input, shape index: {}]   ;;  %s1192_s4 = inlined_call_operand.vmem [shape: f32[1,64], index: 4, kind: input, shape index: {}]   ;;  %s1193_s5 = inlined_call_operand.hbm [shape: f32[2,64,256], index: 5, kind: output, shape index: {}]  }
   0x1   :  { %12 = vsyncpa [#allocation3 + $0x1], 0 }
   0x2   :  { %13 = vsyncpa [#allocation4], 0 }
   0x3   :  { %15 = vsyncpa [#allocation4 + $0x1], 0  ;;  %s897_s18 = smov 0   ;;  %s899_s19 = smov 0  }
   0x4   :  { %s901_s20 = smov 0   ;;  %s903_s21 = smov 0  }
   0x5 LB: > { %s918_s22 = sadd.s32 4294967295, %s861_s21   ;;  %s656_s23 = sadd.s32 4294967294, %s861_s21   ;;  %s861_s21 = sphi %s903_s21, %s1203_s21   ;;  %s857_s20 = sphi %s901_s20, %s1202_s20   ;;  %s853_s19 = sphi %s899_s19, %s1201_s19   ;;  %s849_s18 = sphi %s897_s18, %s1200_s18  }
   0x6   : > { %s922_s24 = sadd.s32 1, %s861_s21   ;;  %s28_s25 = sadd.s32 1, %s857_s20 }
   0x7   : > { %s25_s26 = ssub.s32 %s861_s21, %s922_s24  ;;  %p35_p0 = scmp.ne.s32.totalorder %s857_s20, %s853_s19 }
   0x8   : > { %p26_p1 = scmp.eq.s32.totalorder %s25_s26, 0  ;;  %p36_p2 = scmp.eq.s32.totalorder %s861_s21, 0 }
   0x9   : > { %p41_p3 = scmp.ne.s32.totalorder %s853_s19, %s849_s18  ;;  %p42_p4 = scmp.eq.s32.totalorder %s918_s22, 0 }
   0xa   : > { %s934_s27 = scalar_select %p26_p1, %s857_s20, %s28_s25  }
   0xb   : > { %p936_p5 = por %p36_p2, %p35_p0  ;;  %p940_p6 = por %p42_p4, %p41_p3 }
   0xc   : > { %p149_p7 = scmp.eq.s32.totalorder %s918_s22, 1  ;;  %p155_p8 = scmp.eq.s32.totalorder %s656_s23, 1 }
   0xd   : > { %p712_p10 = scmp.lt.s32.totalorder %s861_s21, 2  ;;  %s187_s7 = sand.u32 1, %s857_s20  }
   0xe   : > { %p947_p11 = por %p149_p7, %p35_p0  ;;  %p951_p12 = por %p155_p8, %p41_p3 }
   0xf   : > { %s698_s8 = sshll.u32 %s861_s21, 7  ;;  %s659_s9 = sshll.u32 %s187_s7, 7 }
  0x10   : > { %s196_s12 = scalar_lea.hbm %s1188_s0, %s698_s8  ;;  %s191_s14 = scalar_lea.vmem [#allocation2], %s659_s9 }
  0x11   : > { %s197_s13 = sshll.u32 %s196_s12, 4  ;;  %s199_s15 = sshll.u32 %s191_s14, 4  ;;  %s198_s13 = int_to_ptr.hbm [resolvable:$true] %s197_s13  ;;  %s200_s15 = int_to_ptr.vmem [resolvable:$true] %s199_s15 }
  0x12   : > { %p962_p13 = pnand %p712_p10, %p936_p5  ;;  %p662_p0 = scmp.ge.s32.totalorder %s861_s21, 1 }
  0x13   : > { %p207_p1 = scmp.lt.s32.totalorder %s861_s21, 3  ;;  %s188_s17 = scalar_lea.sflag [#allocation3], %s187_s7 }
  0x14   : > { %s765_s23 = sshra.s32 %s198_s13, 4  ;;  %p769_p3 = pneg %p962_p13  ;;  %s766_s23 = int_to_ptr.hbm [resolvable:$true] %s765_s23 }
  0x15   : > { %s767_s25 = scalar_lea.hbm %s766_s23, 128  ;;  %s772_s28 = scalar_lea.hbm %s1188_s0, 256 }
  0x16   : > { %p768_p2 = scmp.ne.s32.totalorder %s766_s23, %s767_s25  ;;  %p773_p5 = scmp.lt.s32.totalorder %s766_s23, %s1188_s0 }
  0x17   : > { %p774_p8 = scmp.lt.s32.totalorder %s772_s28, %s767_s25 }
  0x18   : > { %p770_p4 = pnand %p769_p3, %p768_p2 }
  0x19   : > { %p775_p10 = por %p774_p8, %p773_p5 }
  0x1a   : > { %p771_p7 = pneg %p770_p4 }
  0x1c   : > { %p776_p9 = pnand %p775_p10, %p771_p7 }
  0x1e   : > { %779 = shalt.err (!%p776_p9)
}
  0x1f   : > { %s863_s7 = smov 256   ;;  %s864_s11 = smov 16  }
  0x20   : > { %707 = dma.hbm_to_vmem [thread:$0]  (!%p962_p13), %s198_s13, 2048, %s200_s15, %s188_s17, %s863_s7, %s863_s7, %s864_s11  }
  0x21   : > { %p208_p2 = pnand %p662_p0, %p207_p1 }
  0x22   : > { %s983_s12 = sand.u32 (!%p208_p2), 1, %s853_s19  }
  0x23   : > { %211 = sbr.rel (%p208_p2) target bundleno = 652 (0x28c), region = 40  ;;  %s663_s14 = sshll.u32 (!%p208_p2), %s983_s12, 7 }
  0x24   : > { %s214_s23 = scalar_lea.sflag (!%p208_p2), [#allocation3], %s983_s12  ;;  %s989_s25 = scalar_lea.vmem (!%p208_p2), [#allocation2], %s663_s14 }
  0x28   : > { %840 = dma.done.wait (%p940_p6), %s214_s23, 2048  }
  0x29   : > { %842 = vsyncadd (%p940_p6), %s214_s23, 4294965248  ;;  %v996_v0 = vld [vmem:[%s989_s25 + $0x20] sm:$0xff]  ;;  %v999_v1 = vld [vmem:[%s989_s25 + $0x28] sm:$0xff]  ;;  %v326_v49 = vlaneseq  ;;  %vm331_vm0 = vcmask 130112   ;;  %vm335_vm1 = vcmask 195712   ;;  %vm339_vm2 = vcmask 261312  }
  0x2a   : > { %v1002_v2 = vld [vmem:[%s989_s25] sm:$0xff]  ;;  %v264_v3 = vadd.f32 %v999_v1, %v996_v0  ;;  %v1007_v4 = vld [vmem:[%s989_s25 + $0x8] sm:$0xff]  ;;  %v1014_v7 = vld [vmem:[%s989_s25 + $0x30] sm:$0xff]  ;;  %v272_v18 = vmax.f32 %v996_v0, %v999_v1  ;;  %vm343_vm3 = vcmask 326912   ;;  %vm347_vm4 = vcmask 392512   ;;  %s1122_s9 = scalar_lea.vmem [#allocation5], %s663_s14 }
  0x2b   : > { %v270_v5 = vmax.f32 %v1002_v2, %v1007_v4  ;;  %v262_v6 = vadd.f32 %v1007_v4, %v1002_v2  ;;  %v1017_v8 = vld [vmem:[%s989_s25 + $0x38] sm:$0xff]  ;;  %v1020_v9 = vld [vmem:[%s989_s25 + $0x10] sm:$0xff]  ;;  %v1032_v14 = vld [vmem:[%s989_s25 + $0x40] sm:$0xff]  ;;  %v327_v50 = vand.u32 127, %v326_v49  ;;  %vm351_vm5 = vcmask 458112   ;;  %s699_s14 = sshll.u32 %s918_s22, 7 }
  0x2c   : > { %282 = vadd.xlane.f32.xlu1 %v264_v3  ;;  %v1023_v10 = vld [vmem:[%s989_s25 + $0x18] sm:$0xff]  ;;  %v265_v11 = vadd.f32 %v1017_v8, %v1014_v7  ;;  %v1035_v15 = vld [vmem:[%s989_s25 + $0x48] sm:$0xff]  ;;  %v1038_v16 = vld [vmem:[%s989_s25 + $0x50] sm:$0xff]  ;;  %v273_v24 = vmax.f32 %v1014_v7, %v1017_v8  ;;  %vm355_vm6 = vcmask 523712   ;;  %vm382_vm7 = vcmask 1040384   ;;  %s579_s11 = scalar_lea.hbm %s1193_s5, %s699_s14  ;;  %s580_s23 = sshll.u32 %s1122_s9, 4  ;;  %s581_s23 = int_to_ptr.vmem [resolvable:$true] %s580_s23 }
  0x2d   : > { %294 = vmax.xlane.f32.xlu2 %v270_v5  ;;  %278 = vadd.xlane.f32.xlu0 %v262_v6  ;;  %v271_v12 = vmax.f32 %v1020_v9, %v1023_v10  ;;  %v263_v13 = vadd.f32 %v1023_v10, %v1020_v9  ;;  %v1041_v17 = vld [vmem:[%s989_s25 + $0x58] sm:$0xff]  ;;  %v266_v19 = vadd.f32 %v1035_v15, %v1032_v14  ;;  %v1050_v21 = vld [vmem:[%s989_s25 + $0x60] sm:$0xff]  ;;  %v1053_v22 = vld [vmem:[%s989_s25 + $0x68] sm:$0xff]  ;;  %v329_v54 = vadd.s32 4294967288, %v327_v50  ;;  %s568_s29 = scalar_lea.sflag [#allocation4], %s983_s12  ;;  %s815_s17 = scalar_lea.hbm %s1193_s5, 256 }
  0x2e   : > { %v267_v20 = vadd.f32 %v1041_v17, %v1038_v16  ;;  %v268_v23 = vadd.f32 %v1053_v22, %v1050_v21  ;;  %v274_v25 = vmax.f32 %v1032_v14, %v1035_v15  ;;  %v1062_v26 = vld [vmem:[%s989_s25 + $0x70] sm:$0xff]  ;;  %v1065_v27 = vld [vmem:[%s989_s25 + $0x78] sm:$0xff]  ;;  %v275_v28 = vmax.f32 %v1038_v16, %v1041_v17  ;;  %v389_v37 = vld [vmem:[%s1189_s1 + $0x28] sm:$0xff]  ;;  %s582_s25 = sshll.u32 %s579_s11, 4  ;;  %s583_s25 = int_to_ptr.hbm [resolvable:$true] %s582_s25 }
  0x2f   : > { %v269_v29 = vadd.f32 %v1065_v27, %v1062_v26  ;;  %v276_v30 = vmax.f32 %v1050_v21, %v1053_v22  ;;  %v277_v31 = vmax.f32 %v1062_v26, %v1065_v27  ;;  %v391_v32 = vld [vmem:[%s1189_s1 + $0x38] sm:$0xff]  ;;  %v390_v33 = vld [vmem:[%s1189_s1 + $0x30] sm:$0xff]  ;;  %v388_v38 = vld [vmem:[%s1189_s1 + $0x20] sm:$0xff]  ;;  %v333_v58 = vadd.s32 4294967280, %v327_v50  ;;  %s809_s22 = sshra.s32 %s583_s25, 4  ;;  %s810_s22 = int_to_ptr.hbm [resolvable:$true] %s809_s22 }
  0x30   : > { %408 = vmatpush.msra.mxu0 %v391_v32  ;;  %v387_v39 = vld [vmem:[%s1189_s1 + $0x18] sm:$0xff]  ;;  %v386_v40 = vld [vmem:[%s1189_s1 + $0x10] sm:$0xff]  ;;  %v385_v44 = vld [vmem:[%s1189_s1 + $0x8] sm:$0xff]  ;;  %v337_v61 = vadd.s32 4294967272, %v327_v50  ;;  %vm396_vm8 = vcmask 523264   ;;  %vm430_vm9 = vcmask 1043456   ;;  %p816_p0 = scmp.lt.s32.totalorder %s810_s22, %s1193_s5 }
  0x31   : > { %v384_v45 = vld [vmem:[%s1189_s1] sm:$0xff]  ;;  %vm426_vm10 = vcmask 31744   ;;  %s811_s13 = scalar_lea.hbm %s810_s22, 128 }
  0x32   : > { %409 = vmatpush.msra.mxu0 %v390_v33  ;;  %p812_p6 = scmp.ne.s32.totalorder %s810_s22, %s811_s13  ;;  %p817_p1 = scmp.lt.s32.totalorder %s815_s17, %s811_s13 }
  0x34   : > { %284 = vadd.xlane.f32.xlu1 %v265_v11  ;;  %410 = vmatpush.msra.mxu0 %v389_v37  ;;  %v341_v11 = vadd.s32 4294967264, %v327_v50  ;;  %v353_v37 = vadd.s32 4294967240, %v327_v50  ;;  %p813_p9 = pnand %p812_p6, %p947_p11  ;;  %p818_p3 = por %p817_p1, %p816_p0 }
  0x35   : > { %296 = vmax.xlane.f32.xlu2 %v271_v12  ;;  %280 = vadd.xlane.f32.xlu0 %v263_v13 }
  0x36   : > { %411 = vmatpush.msra.mxu0 %v388_v38  ;;  %p814_p13 = pneg %p813_p9 }
  0x38   : > { %412 = vmatpush.msra.mxu0 %v387_v39  ;;  %p819_p4 = pnand %p818_p3, %p814_p13 }
  0x3a   : > { %413 = vmatpush.msra.mxu0 %v386_v40 }
  0x3c   : > { %298 = vmax.xlane.f32.xlu1 %v272_v18  ;;  %414 = vmatpush.msra.mxu0 %v385_v44 }
  0x3d   : > { %286 = vadd.xlane.f32.xlu0 %v266_v19  ;;  %288 = vadd.xlane.f32.xlu2 %v267_v20  ;;  %v345_v19 = vadd.s32 4294967256, %v327_v50  ;;  %v349_v20 = vadd.s32 4294967248, %v327_v50 }
  0x3e   : > { %415 = vmatpush.msra.mxu0 %v384_v45 }
  0x44   : > { %290 = vadd.xlane.f32.xlu1 %v268_v23 }
  0x45   : > { %300 = vmax.xlane.f32.xlu0 %v273_v24  ;;  %302 = vmax.xlane.f32.xlu2 %v274_v25 }
  0x4c   : > { %304 = vmax.xlane.f32.xlu1 %v275_v28 }
  0x4d   : > { %292 = vadd.xlane.f32.xlu0 %v269_v29  ;;  %306 = vmax.xlane.f32.xlu2 %v276_v30 }
  0x55   : > { %308 = vmax.xlane.f32.xlu0 %v277_v31 }
  0x9f   : > { %v283_v34 = vpop.xlane.xlu1 %282 }
  0xa0   : > { %v295_v35 = vpop.xlane.xlu2 %294  ;;  %v279_v36 = vpop.xlane.xlu0 %278  ;;  %v312_v59 = vmul.f32 0.00390625, %v283_v34 }
  0xa1   : > { %v310_v53 = vmul.f32 0.00390625, %v279_v36  ;;  %v366_v62 = vperm.slane %v295_v35, %v327_v50 }
  0xa2   : > { %v334_v13 = vperm.slane %v312_v59, %v333_v58 }
  0xa3   : > { %v328_v60 = vperm.slane %v310_v53, %v327_v50 }
  0xa7   : > { %v285_v41 = vpop.xlane.xlu1 %284 }
  0xa8   : > { %v297_v42 = vpop.xlane.xlu2 %296  ;;  %v281_v43 = vpop.xlane.xlu0 %280  ;;  %v313_v63 = vmul.f32 0.00390625, %v285_v41 }
  0xa9   : > { %v311_v51 = vmul.f32 0.00390625, %v281_v43  ;;  %v367_v3 = vperm.slane %v297_v42, %v329_v54 }
  0xaa   : > { %v338_v25 = vperm.slane %v313_v63, %v337_v61 }
  0xab   : > { %v330_v57 = vperm.slane %v311_v51, %v329_v54  ;;  %v368_v28 = vsel %vm331_vm0, %v367_v3, %v366_v62  ;;  %v479_v62 = vshrl.u32 %v326_v49, 7 }
  0xad   : > { %v332_v5 = vsel %vm331_vm0, %v330_v57, %v328_v60  ;;  %v421_v57 = vld [vmem:[%s1191_s3] sm:$0xf]  ;;  %750 = vset.pattern.permute.xlu1 %v479_v62  ;;  %v492_v63 = vadd.s32 16, %v479_v62  ;;  %v486_v3 = vadd.s32 8, %v479_v62 }
  0xae   : > { %v336_v29 = vsel %vm335_vm1, %v334_v13, %v332_v5  ;;  %674 = vmatpush.msk.msra.mxu1 %vm430_vm9, %v421_v57  ;;  %v760_v5 = vld [vmem:[%s1192_s4] ss:$0 sm:$0xff] }
  0xaf   : > { %v299_v46 = vpop.xlane.xlu1 %298  ;;  %v340_v40 = vsel %vm339_vm2, %v338_v25, %v336_v29  ;;  %752 = vset.pattern.permute.xlu0 %v492_v63  ;;  %751 = vset.pattern.permute.xlu2 %v486_v3 }
  0xb0   : > { %v287_v47 = vpop.xlane.xlu0 %286  ;;  %v289_v48 = vpop.xlane.xlu2 %288  ;;  %v369_v6 = vperm.slane %v299_v46, %v333_v58  ;;  %v759_v58 = vld [vmem:[%s1190_s2] ss:$0 sm:$0xff] }
  0xb1   : > { %v314_v12 = vmul.f32 0.00390625, %v287_v47  ;;  %v315_v30 = vmul.f32 0.00390625, %v289_v48 }
  0xb2   : > { %v370_v31 = vsel %vm335_vm1, %v369_v6, %v368_v28 }
  0xb3   : > { %v342_v32 = vperm.slane %v314_v12, %v341_v11  ;;  %v346_v41 = vperm.slane %v315_v30, %v345_v19 }
  0xb5   : > { %v344_v42 = vsel %vm343_vm3, %v342_v32, %v340_v40 }
  0xb6   : > { %v348_v51 = vsel %vm347_vm4, %v346_v41, %v344_v42 }
  0xb7   : > { %v291_v52 = vpop.xlane.xlu1 %290 }
  0xb8   : > { %v301_v55 = vpop.xlane.xlu0 %300  ;;  %v303_v56 = vpop.xlane.xlu2 %302  ;;  %v316_v33 = vmul.f32 0.00390625, %v291_v52 }
  0xb9   : > { %v371_v18 = vperm.slane %v301_v55, %v337_v61  ;;  %v373_v34 = vperm.slane %v303_v56, %v341_v11 }
  0xba   : > { %v350_v43 = vperm.slane %v316_v33, %v349_v20 }
  0xbb   : > { %v372_v35 = vsel %vm339_vm2, %v371_v18, %v370_v31 }
  0xbc   : > { %v374_v44 = vsel %vm343_vm3, %v373_v34, %v372_v35  ;;  %v352_v53 = vsel %vm351_vm5, %v350_v43, %v348_v51  ;;  %v498_v35 = vadd.s32 24, %v479_v62 }
  0xbf   : > { %v305_v23 = vpop.xlane.xlu1 %304 }
  0xc0   : > { %v293_v24 = vpop.xlane.xlu0 %292  ;;  %v375_v36 = vperm.slane %v305_v23, %v345_v19  ;;  %v307_v39 = vpop.xlane.xlu2 %306 }
  0xc1   : > { %v317_v38 = vmul.f32 0.00390625, %v293_v24  ;;  %v377_v45 = vperm.slane %v307_v39, %v349_v20  ;;  %v516_v39 = vadd.s32 48, %v479_v62 }
  0xc2   : > { %v376_v46 = vsel %vm347_vm4, %v375_v36, %v374_v44  ;;  %v504_v36 = vadd.s32 32, %v479_v62 }
  0xc3   : > { %v354_v47 = vperm.slane %v317_v38, %v353_v37  ;;  %v378_v50 = vsel %vm351_vm5, %v377_v45, %v376_v46  ;;  %v510_v38 = vadd.s32 40, %v479_v62 }
  0xc5   : > { %v356_v54 = vsel %vm355_vm6, %v354_v47, %v352_v53 }
  0xc8   : > { %v309_v48 = vpop.xlane.xlu0 %308 }
  0xc9   : > { %v379_v52 = vperm.slane %v309_v48, %v353_v37  ;;  %v522_v37 = vadd.s32 56, %v479_v62 }
  0xcb   : > { %v380_v55 = vsel %vm355_vm6, %v379_v52, %v378_v50 }
  0xcc   : > { %v383_v56 = vsel %vm382_vm7, %v356_v54, %v380_v55 }
  0xcd   : > { %673 = vmatmul.msk.f32.vlgmr.msra.gmra.mxu0 %vm396_vm8, %v383_v56 }
 0x14a   : > { %v417_v59 = vpop.f32.mrf.mxu0 }
 0x14b   : > { %v418_v60 = vadd.f32 %v759_v58, %v417_v59 }
 0x14d   : > { %v420_v61 = vmax.f32 %v418_v60, 0.0 }
 0x14f   : > { %675 = vmatmul.msk.f32.vlgmr.msra.gmra.mxu1 %vm426_vm10, %v420_v61 }
 0x1cc   : > { %v451_v6 = vpop.f32.mrf.mxu1 }
 0x1cd   : > { %v452_v11 = vadd.f32 %v760_v5, %v451_v6 }
 0x1cf   : > { %v455_v12 = vrot.slane %v452_v11, 1 }
 0x1d1   : > { %v457_v13 = vadd.f32 %v455_v12, %v452_v11 }
 0x1d3   : > { %v676_v18 = vmul.f32 -1.442695, %v457_v13 }
 0x1d5   : > { %761 = vpow2.f32 %v676_v18 }
 0x1db   : > { %v762_v19 = vpop.eup %761 }
 0x1dc   : > { %v461_v20 = vadd.f32 1.0, %v762_v19 }
 0x1de   : > { %763 = vrcp.f32 %v461_v20  ;;  %v473_v25 = vand.u32 2147483648, %v461_v20  ;;  %v471_v29 = vand.u32 2147483647, %v461_v20  ;;  %vm467_vm12 = vweird.f32 %v461_v20 }
 0x1e0   : > { %v474_v31 = vor.u32 1.1754944e-38, %v473_v25  ;;  %vm472_vm14 = vcmp.eq.f32.partialorder %v471_v29, 8.507059e+37 }
 0x1e4   : > { %v764_v23 = vpop.eup %763 }
 0x1e5   : > { %v463_v49 = vmul.f32 %v764_v23, %v461_v20  ;;  %vm468_vm11 = vweird.f32 %v764_v23 }
 0x1e6   : > { %vm469_vm13 = vmor %vm467_vm12, %vm468_vm11 }
 0x1e7   : > { %v464_v24 = vsub.f32 1.0, %v463_v49 }
 0x1e9   : > { %v465_v28 = vmul.f32 %v764_v23, %v464_v24 }
 0x1eb   : > { %v466_v30 = vadd.f32 %v764_v23, %v465_v28 }
 0x1ed   : > { %v470_v32 = vsel %vm469_vm13, %v764_v23, %v466_v30 }
 0x1ee   : > { %v475_v33 = vsel %vm472_vm14, %v474_v31, %v470_v32 }
 0x1ef   : > { %v477_v34 = vperm.slane %v475_v33, 0 }
 0x1f1   : > { %494 = vperm.xlu0 %752, %v477_v34   ;;  %488 = vperm.xlu2 %751, %v477_v34  }
 0x1f2   : > { %482 = vperm.xlu1 %750, %v477_v34  }
 0x1f9   : > { %753 = vset.pattern.permute.xlu2 %v498_v35  ;;  %758 = vset.pattern.permute.xlu0 %v522_v37 }
 0x1fa   : > { %754 = vset.pattern.permute.xlu1 %v504_v36 }
 0x201   : > { %500 = vperm.xlu2 %753, %v477_v34  }
 0x202   : > { %506 = vperm.xlu1 %754, %v477_v34  }
 0x209   : > { %755 = vset.pattern.permute.xlu2 %v510_v38 }
 0x20a   : > { %756 = vset.pattern.permute.xlu1 %v516_v39 }
 0x211   : > { %512 = vperm.xlu2 %755, %v477_v34  }
 0x212   : > { %518 = vperm.xlu1 %756, %v477_v34  }
 0x219   : > { %757 = vset.pattern.permute.xlu2 %v522_v37 }
 0x221   : > { %524 = vperm.xlu2 %757, %v477_v34  }
 0x24b   : > { %v489_v40 = vpop.permute.xlu2 %488 }
 0x24c   : > { %v527_v41 = vmul.f32 %v489_v40, %v1020_v9  ;;  %v551_v42 = vmul.f32 %v1023_v10, %v489_v40 }
 0x24e   : > { %535 = vst [vmem:[%s1122_s9 + $0x10] sm:$0xff] %v527_v41 }
 0x24f   : > { %686 = vst [vmem:[%s1122_s9 + $0x18] sm:$0xff] %v551_v42 }
 0x25b   : > { %v501_v43 = vpop.permute.xlu2 %500 }
 0x25c   : > { %v529_v44 = vmul.f32 %v501_v43, %v1014_v7  ;;  %v553_v9 = vmul.f32 %v1017_v8, %v501_v43 }
 0x25e   : > { %537 = vst [vmem:[%s1122_s9 + $0x30] sm:$0xff] %v529_v44 }
 0x25f   : > { %688 = vst [vmem:[%s1122_s9 + $0x38] sm:$0xff] %v553_v9 }
 0x263   : > { %v495_v10 = vpop.permute.xlu0 %494 }
 0x264   : > { %v528_v45 = vmul.f32 %v495_v10, %v996_v0  ;;  %v552_v46 = vmul.f32 %v999_v1, %v495_v10  ;;  %v483_v47 = vpop.permute.xlu1 %482 }
 0x265   : > { %v526_v48 = vmul.f32 %v483_v47, %v1002_v2  ;;  %v550_v51 = vmul.f32 %v1007_v4, %v483_v47 }
 0x266   : > { %536 = vst [vmem:[%s1122_s9 + $0x20] sm:$0xff] %v528_v45 }
 0x267   : > { %687 = vst [vmem:[%s1122_s9 + $0x28] sm:$0xff] %v552_v46 }
 0x268   : > { %534 = vst [vmem:[%s1122_s9] sm:$0xff] %v526_v48 }
 0x269   : > { %685 = vst [vmem:[%s1122_s9 + $0x8] sm:$0xff] %v550_v51 }
 0x26b   : > { %v513_v7 = vpop.permute.xlu2 %512 }
 0x26c   : > { %v531_v8 = vmul.f32 %v513_v7, %v1038_v16  ;;  %v555_v0 = vmul.f32 %v1041_v17, %v513_v7 }
 0x26e   : > { %539 = vst [vmem:[%s1122_s9 + $0x50] sm:$0xff] %v531_v8 }
 0x26f   : > { %690 = vst [vmem:[%s1122_s9 + $0x58] sm:$0xff] %v555_v0 }
 0x274   : > { %v507_v1 = vpop.permute.xlu1 %506 }
 0x275   : > { %v530_v2 = vmul.f32 %v507_v1, %v1032_v14  ;;  %v554_v4 = vmul.f32 %v1035_v15, %v507_v1 }
 0x277   : > { %538 = vst [vmem:[%s1122_s9 + $0x40] sm:$0xff] %v530_v2 }
 0x278   : > { %689 = vst [vmem:[%s1122_s9 + $0x48] sm:$0xff] %v554_v4 }
 0x27b   : > { %v525_v52 = vpop.permute.xlu2 %524 }
 0x27c   : > { %v533_v50 = vmul.f32 %v525_v52, %v1062_v26  ;;  %v557_v16 = vmul.f32 %v1065_v27, %v525_v52 }
 0x27e   : > { %541 = vst [vmem:[%s1122_s9 + $0x70] sm:$0xff] %v533_v50 }
 0x27f   : > { %692 = vst [vmem:[%s1122_s9 + $0x78] sm:$0xff] %v557_v16 }
 0x284   : > { %v519_v14 = vpop.permute.xlu1 %518 }
 0x285   : > { %v532_v15 = vmul.f32 %v519_v14, %v1050_v21  ;;  %v556_v17 = vmul.f32 %v1053_v22, %v519_v14 }
 0x287   : > { %540 = vst [vmem:[%s1122_s9 + $0x60] sm:$0xff] %v532_v15 }
 0x288   : > { %691 = vst [vmem:[%s1122_s9 + $0x68] sm:$0xff] %v556_v17 }
 0x289   : > { %822 = shalt.err (!%p819_p4)
}
 0x28a   : > { %s865_s12 = smov 256   ;;  %s866_s28 = smov 16  }
 0x28b   : > { %702 = dma.vmem_to_hbm [thread:$0]  (%p947_p11), %s581_s23, 2048, %s583_s25, %s568_s29, %s865_s12, %s865_s12, %s866_s28  }
 0x28c PF: > { %s597_s9 = sand.u32 1, %s849_s18   ;;  %p1199_p7 = scmp.ge.s32.totalorder %s861_s21, 2 }
 0x28d   : > { %s598_s14 = scalar_lea.sflag [#allocation4], %s597_s9 }
 0x28e   : > { %p709_p5 = pnand %p1199_p7, %p951_p12 }
 0x290   : > { %p710_p8 = pneg %p709_p5 }
 0x292   : > { %844 = dma.done.wait (%p710_p8), %s598_s14, 2048  }
 0x293   : > { %846 = vsyncadd (%p710_p8), %s598_s14, 4294965248  ;;  %p18_p10 = scmp.ge.s32.totalorder %s922_s24, 4   ;;  %s1200_s18 = smov %s853_s19 }
 0x294   : > { %s1201_s19 = smov %s857_s20  ;;  %s1202_s20 = smov %s934_s27 }
 0x295   : > { %s1203_s21 = smov %s922_s24  ;;  %20 = sbr.rel (!%p18_p10) target bundleno = 5 (0x5), region = 87 }
 0x29a   :  { %604 = vsyncpa [#allocation3], 1 }
 0x29b   :  { %606 = vsyncpa [#allocation3 + $0x1], 1 }
 0x29c   :  { %607 = vsyncpa [#allocation4], 1 }
 0x29d   :  { %609 = vsyncpa [#allocation4 + $0x1], 1 }

</bundles_post_ra>
